<compile_context>
chip_gen: v6e
topology: v6e:2x2x1
jax: 0.10.0
libtpu: 0.0.40
codegen_flags: <defaults>
</compile_context>

<pallas_src>
import functools

import jax
import jax.numpy as jnp
import numpy as np
from jax.experimental import pallas as pl
from jax.experimental.pallas import tpu as pltpu

_LANES = 128
_SUBLANES = 8
_TILE_BYTES = 2 * 1024 * 1024   # target bytes per (TB, Dp) diff block
_MAX_TILE_ROWS = 1024           # 512-1024 row tiles ~ HBM roofline


def _round_up(x, m):
    return (x + m - 1) // m * m


def _robust_term_kernel(sig_ref, diff_ref, w_ref, out_ref):
    """One row tile of   sum_r  w_r * sigma * ||d_r||^2 / (sigma + ||d_r||^2).

    sig_ref  : (1,)        f32  sigma (SMEM scalar)
    diff_ref : (TB, Dp)    f32  row tile of difference vectors
    w_ref    : (1, TB)     f32  lane-dense per-row weights for this tile
    out_ref  : (1, 8, 128) f32  per-tile partial sum (replicated over block)
    """
    sigma = sig_ref[0]
    d = diff_ref[...]                                   # (TB, Dp)
    sq = jnp.sum(d * d, axis=1, keepdims=True)          # (TB, 1)  lane reduce
    g = (sigma * sq) / (sigma + sq)                     # (TB, 1)  Geman-McClure
    # Weighted row-sum on the (otherwise idle) MXU with (8,128)-aligned shapes:
    #   (8, TB) @ (TB, 128) -> (8, 128); every element equals sum_r w_r * g_r.
    w8 = jnp.broadcast_to(w_ref[...], (_SUBLANES, d.shape[0]))
    gb = jnp.broadcast_to(g, (d.shape[0], _LANES))
    part = jnp.dot(w8, gb, preferred_element_type=jnp.float32,
                   precision=jax.lax.Precision.HIGHEST)
    out_ref[...] = part[None, :, :]


def _robust_weighted_sum(diff, weights, sigma):
    """sum_r weights_r * sigma * ||diff_r||^2 / (sigma + ||diff_r||^2), tiled."""
    n, d = diff.shape
    if n == 0:
        return jnp.float32(0.0)

    d_pad = _round_up(d, _LANES)
    # Row tile: multiple of 128 (keeps the lane-dense weight block legal and
    # sublanes full), sized so one diff block stays around _TILE_BYTES.
    # TODO(synk): for very large D, also tile D as an inner reduction axis.
    cap = (_TILE_BYTES // (d_pad * 4)) // _LANES * _LANES
    cap = max(_LANES, min(_MAX_TILE_ROWS, cap))
    tb = int(min(cap, _round_up(n, _LANES)))
    n_pad = _round_up(n, tb)
    nb = n_pad // tb

    diff_p = jnp.pad(diff.astype(jnp.float32),
                     ((0, n_pad - n), (0, d_pad - d)))
    w_p = jnp.pad(weights.astype(jnp.float32),
                  (0, n_pad - n)).reshape(1, n_pad)
    sig = jnp.asarray(sigma, jnp.float32).reshape(1)

    partials = pl.pallas_call(
        _robust_term_kernel,
        grid=(nb,),
        in_specs=[
            pl.BlockSpec(memory_space=pltpu.MemorySpace.SMEM),    # sigma
            pl.BlockSpec((tb, d_pad), lambda i: (i, 0)),          # diff rows
            pl.BlockSpec((1, tb), lambda i: (0, i)),              # weights
        ],
        out_specs=pl.BlockSpec((1, _SUBLANES, _LANES), lambda i: (i, 0, 0)),
        out_shape=jax.ShapeDtypeStruct((nb, _SUBLANES, _LANES), jnp.float32),
        compiler_params=pltpu.CompilerParams(
            dimension_semantics=("parallel",),
            vmem_limit_bytes=32 * 1024 * 1024,
        ),
    )(sig, diff_p, w_p)
    return partials[:, 0, 0].sum()


@functools.partial(jax.jit, static_argnames=("size_average",))
def _dcc_loss_forward(U, enc_out, sampweights, pairweights, pairs, index,
                      sigma1, sigma2, lam, *, size_average):
    enc2d = enc_out.reshape(enc_out.shape[0], -1).astype(jnp.float32)
    nelem = enc2d.size
    index = index.astype(jnp.int32)
    pairs = pairs.astype(jnp.int32)

    centroids = U.astype(jnp.float32)[index]                  # (B, D)
    d_samp = enc2d - centroids                                # (B, D)
    # TODO(synk): for P >> B the pair gather could move into the kernel
    # (centroids resident in VMEM + in-kernel row gather) to drop another
    # ~2*P*D bytes of HBM traffic; Pallas TPU has no robust vectorized
    # row-gather primitive, so we keep the gather in the XLA fusion but
    # pre-difference it so the kernel streams one (P, D) array, not two.
    d_pair = centroids[pairs[:, 0]] - centroids[pairs[:, 1]]  # (P, D)

    term1 = _robust_weighted_sum(d_samp, sampweights.reshape(-1), sigma1)
    term2 = _robust_weighted_sum(d_pair, pairweights.reshape(-1), sigma2)
    out = term1 + jnp.asarray(lam, jnp.float32) * term2
    if size_average:
        out = out / nelem
    return out


class DCCLossPallas:
    """JAX/Pallas port of the PyTorch DCCLoss module (forward only)."""

    def __init__(self, nsamples, ndim, initU, size_average=True):
        self.dim = ndim
        self.nsamples = nsamples
        self.size_average = size_average
        initU = np.asarray(initU, dtype=np.float32)
        assert np.isfinite(initU).all(), "Nan found in initialization"
        # deterministic analogue of the 1e-6 * randn initialization noise
        rng = np.random.RandomState(0)
        self.U = jnp.asarray(
            initU + 1e-6 * rng.randn(*initU.shape).astype(np.float32))

    def __call__(self, enc_out, sampweights, pairweights, pairs, index,
                 _sigma1, _sigma2, _lambda):
        return _dcc_loss_forward(
            self.U, enc_out, sampweights, pairweights, pairs, index,
            jnp.float32(_sigma1), jnp.float32(_sigma2), jnp.float32(_lambda),
            size_average=self.size_average)


def _reference_loss(U, enc_out, sampweights, pairweights, pairs, index,
                    s1, s2, lam, size_average=True):
    enc2d = enc_out.reshape(enc_out.shape[0], -1)
    centroids = U[index]
    out1 = jnp.sum((enc2d - centroids) ** 2, axis=1)
    out11 = jnp.sum(s1 * sampweights * out1 / (s1 + out1))
    d2 = centroids[pairs[:, 0]] - centroids[pairs[:, 1]]
    out2 = jnp.sum(d2 ** 2, axis=1)
    out21 = lam * jnp.sum(s2 * pairweights * out2 / (s2 + out2))
    out = out11 + out21
    if size_average:
        out = out / enc2d.size
    return out


if __name__ == "__main__":
    # ---- Case 1: tiny shapes (single tile per term) -------------------------
    k = jax.random.split(jax.random.PRNGKey(0), 6)
    nsamples, ndim = 16, 32
    B, P = 8, 12
    initU = np.asarray(jax.random.normal(k[0], (nsamples, ndim), jnp.float32))
    loss_mod = DCCLossPallas(nsamples, ndim, initU, size_average=True)

    enc_out = jax.random.normal(k[1], (B, ndim), jnp.float32)
    sampweights = jax.random.uniform(k[2], (B,), jnp.float32, 0.1, 1.0)
    pairweights = jax.random.uniform(k[3], (P,), jnp.float32, 0.1, 1.0)
    index = jax.random.randint(k[4], (B,), 0, nsamples, jnp.int32)
    pairs = jax.random.randint(k[5], (P, 2), 0, B, jnp.int32)
    sigma1, sigma2, lam = 2.0, 3.0, 0.5

    out = loss_mod(enc_out, sampweights, pairweights, pairs, index,
                   sigma1, sigma2, lam)
    out = jax.block_until_ready(out)
    ref = _reference_loss(loss_mod.U, enc_out, sampweights, pairweights,
                          pairs, index, sigma1, sigma2, lam, True)
    assert np.allclose(np.asarray(out), np.asarray(ref),
                       rtol=1e-4, atol=1e-5), (out, ref)

    # ---- Case 2: enough rows to exercise a multi-tile grid + tail padding ---
    k = jax.random.split(jax.random.PRNGKey(1), 6)
    nsamples2, ndim2 = 64, 40
    B2, P2 = 520, 1300
    initU2 = np.asarray(jax.random.normal(k[0], (nsamples2, ndim2), jnp.float32))
    loss_mod2 = DCCLossPallas(nsamples2, ndim2, initU2, size_average=True)

    enc_out2 = jax.random.normal(k[1], (B2, ndim2), jnp.float32)
    sampweights2 = jax.random.uniform(k[2], (B2,), jnp.float32, 0.1, 1.0)
    pairweights2 = jax.random.uniform(k[3], (P2,), jnp.float32, 0.1, 1.0)
    index2 = jax.random.randint(k[4], (B2,), 0, nsamples2, jnp.int32)
    pairs2 = jax.random.randint(k[5], (P2, 2), 0, B2, jnp.int32)

    out2 = loss_mod2(enc_out2, sampweights2, pairweights2, pairs2, index2,
                     1.5, 2.5, 0.8)
    out2 = jax.block_until_ready(out2)
    ref2 = _reference_loss(loss_mod2.U, enc_out2, sampweights2, pairweights2,
                           pairs2, index2, 1.5, 2.5, 0.8, True)
    assert np.allclose(np.asarray(out2), np.asarray(ref2),
                       rtol=1e-4, atol=1e-5), (out2, ref2)

    print("KERNEL_OK")
</pallas_src>

<mosaic_0001>
module attributes {stable_mosaic.version = 11 : i64} {
  func.func @_robust_term_kernel(%arg0: i32, %arg1: memref<1xf32, #tpu.memory_space<smem>>, %arg2: memref<128x128xf32, #tpu.memory_space<vmem>>, %arg3: memref<1x128xf32, #tpu.memory_space<vmem>>, %arg4: memref<1x8x128xf32, #tpu.memory_space<vmem>>) attributes {dimension_semantics = [#tpu.dimension_semantics<parallel>], iteration_bounds = array<i64: 1>, scalar_prefetch = 0 : i64, scratch_operands = 0 : i64, tpu.core_type = #tpu.core_type<tc>, window_params = [{transform_indices = @transform_0, window_bounds = array<i64: 1>}, {transform_indices = @transform_1, window_bounds = array<i64: 128, 128>}, {transform_indices = @transform_2, window_bounds = array<i64: 1, 128>}, {transform_indices = @transform_3, window_bounds = array<i64: 1, 8, 128>}]} {
    %c0 = arith.constant 0 : index
    %0 = memref.load %arg1[%c0] : memref<1xf32, #tpu.memory_space<smem>>
    %c0_0 = arith.constant 0 : index
    %c0_1 = arith.constant 0 : index
    %1 = vector.load %arg2[%c0_0, %c0_1] : memref<128x128xf32, #tpu.memory_space<vmem>>, vector<128x128xf32>
    %2 = arith.mulf %1, %1 : vector<128x128xf32>
    %cst = arith.constant dense<0.000000e+00> : vector<128xf32>
    %3 = vector.multi_reduction <add>, %2, %cst [1] : vector<128x128xf32> to vector<128xf32>
    %4 = vector.shape_cast %3 : vector<128xf32> to vector<128x1xf32>
    %5 = vector.broadcast %0 : f32 to vector<128x1xf32>
    %6 = arith.mulf %5, %4 : vector<128x1xf32>
    %7 = vector.broadcast %0 : f32 to vector<128x1xf32>
    %8 = arith.addf %7, %4 : vector<128x1xf32>
    %9 = arith.divf %6, %8 : vector<128x1xf32>
    %c0_2 = arith.constant 0 : index
    %c0_3 = arith.constant 0 : index
    %10 = vector.load %arg3[%c0_2, %c0_3] : memref<1x128xf32, #tpu.memory_space<vmem>>, vector<1x128xf32>
    %11 = vector.shape_cast %10 : vector<1x128xf32> to vector<1x128xf32>
    %12 = vector.broadcast %11 : vector<1x128xf32> to vector<8x128xf32>
    %13 = vector.shape_cast %9 : vector<128x1xf32> to vector<128x1xf32>
    %14 = vector.broadcast %13 : vector<128x1xf32> to vector<128x128xf32>
    %cst_4 = arith.constant dense<0.000000e+00> : vector<8x128xf32>
    %15 = tpu.matmul %12, %14, %cst_4 {dimension_numbers = #tpu.dot_dimension_numbers<[1], [0], [0], [1], [0, 0, 1, 1], [], []>, precision = #tpu.contract_precision<fp32>} : vector<8x128xf32>, vector<128x128xf32>, vector<8x128xf32> -> vector<8x128xf32>
    %16 = vector.shape_cast %15 : vector<8x128xf32> to vector<1x8x128xf32>
    %c0_5 = arith.constant 0 : index
    %c0_6 = arith.constant 0 : index
    %c0_7 = arith.constant 0 : index
    %17 = vector.load %arg4[%c0_5, %c0_6, %c0_7] : memref<1x8x128xf32, #tpu.memory_space<vmem>>, vector<1x8x128xf32>
    tpu.vector_store %arg4[%c0_5, %c0_6, %c0_7], %16 {strides = array<i32>} : memref<1x8x128xf32, #tpu.memory_space<vmem>>, vector<1x8x128xf32>,
    return
  }
  func.func @transform_0(%arg0: i32) -> i32 {
    %c0_i32 = arith.constant 0 : i32
    %c0_i32_0 = arith.constant 0 : i32
    return %c0_i32 : i32
  }
  func.func @transform_1(%arg0: i32) -> (i32, i32) {
    %c0_i32 = arith.constant 0 : i32
    %c0_i32_0 = arith.constant 0 : i32
    return %arg0, %c0_i32 : i32, i32
  }
  func.func @transform_2(%arg0: i32) -> (i32, i32) {
    %c0_i32 = arith.constant 0 : i32
    %c0_i32_0 = arith.constant 0 : i32
    return %c0_i32, %arg0 : i32, i32
  }
  func.func @transform_3(%arg0: i32) -> (i32, i32, i32) {
    %c0_i32 = arith.constant 0 : i32
    %c0_i32_0 = arith.constant 0 : i32
    %c0_i32_1 = arith.constant 0 : i32
    return %arg0, %c0_i32, %c0_i32_0 : i32, i32, i32
  }
}

</mosaic_0001>

<bundles_post_ra>
// kernel: sub.2
= control target key start
LH: loop header
LB: loop body
LE: loop exit
PB: predicated region body
PF: predicated region fallthrough
CT: control target
= control target key end

     0   :  { %s34_s0 = inlined_call_operand.vmem [shape: f32[8,32], index: 0, kind: input, shape index: {}]   ;;  %s35_s1 = inlined_call_operand.vmem [shape: f32[8,32], index: 1, kind: input, shape index: {}]   ;;  %s36_s2 = inlined_call_operand.vmem [shape: f32[8,32], index: 2, kind: output, shape index: {}]  }
   0x1   :  { %v3_v0 = vld [vmem:[%s34_s0] sm:$0xff] }
   0x2   :  { %v4_v1 = vld [vmem:[%s35_s1] sm:$0xff] }
   0x3   :  { %v7_v2 = vsub.f32 %v3_v0, %v4_v1 }
   0x5   :  { %9 = vst [vmem:[%s36_s2] sm:$0xff] %v7_v2 }

// kernel: sub.3
= control target key start
LH: loop header
LB: loop body
LE: loop exit
PB: predicated region body
PF: predicated region fallthrough
CT: control target
= control target key end

     0   :  { %s56_s0 = inlined_call_operand.vmem [shape: f32[12,32], index: 0, kind: input, shape index: {}]   ;;  %s57_s1 = inlined_call_operand.vmem [shape: f32[12,32], index: 1, kind: input, shape index: {}]   ;;  %s58_s2 = inlined_call_operand.vmem [shape: f32[12,32], index: 2, kind: output, shape index: {}]  }
   0x1   :  { %v3_v0 = vld [vmem:[%s56_s0] sm:$0xff]  ;;  %v20_v2 = vld [vmem:[%s56_s0 + $0x8] sm:$0xff] }
   0x2   :  { %v4_v1 = vld [vmem:[%s57_s1] sm:$0xff]  ;;  %v21_v4 = vld [vmem:[%s57_s1 + $0x8] sm:$0xff] }
   0x3   :  { %v7_v3 = vsub.f32 %v3_v0, %v4_v1  ;;  %v16_v5 = vsub.f32 %v20_v2, %v21_v4 }
   0x5   :  { %9 = vst [vmem:[%s58_s2] sm:$0xff] %v7_v3  ;;  %22 = vst [vmem:[%s58_s2 + $0x8] sm:$0xff] %v16_v5 }

// kernel: _dcc_loss_forward.2
= control target key start
LH: loop header
LB: loop body
LE: loop exit
PB: predicated region body
PF: predicated region fallthrough
CT: control target
= control target key end

     0   :  { %v1145_v32 = vmov 0.0   ;;  %vm1146_vm0 = vmmov 0   ;;  %s1661_s1 = inlined_call_operand.vmem [shape: f32[128,128], index: 1, kind: input, shape index: {}]   ;;  %s1662_s0 = inlined_call_operand.<no memory space> [shape: f32[1], index: 0, kind: input, shape index: {}]   ;;  %s1663_s2 = inlined_call_operand.vmem [shape: f32[1,128], index: 2, kind: input, shape index: {}]   ;;  %s1664_s3 = inlined_call_operand.vmem [shape: f32[1,8,128], index: 3, kind: output, shape index: {}]  }
   0x1   :  { %v31_v0 = vld [vmem:[%s1661_s1 + $0x78] sm:$0xff]  ;;  %v29_v1 = vld [vmem:[%s1661_s1 + $0x68] sm:$0xff]  ;;  %v30_v2 = vld [vmem:[%s1661_s1 + $0x70] sm:$0xff]  ;;  %901 = vmatprep.subr.mxu0 %v1145_v32  ;;  %936 = vmatprep.subr.mxu1 %v1145_v32  ;;  %v1224_v33 = vstv %s1662_s0 }
   0x2   :  { %v47_v3 = vmul.f32 %v31_v0, %v31_v0  ;;  %v45_v4 = vmul.f32 %v29_v1, %v29_v1  ;;  %v28_v5 = vld [vmem:[%s1661_s1 + $0x60] sm:$0xff]  ;;  %v46_v6 = vmul.f32 %v30_v2, %v30_v2  ;;  %v27_v8 = vld [vmem:[%s1661_s1 + $0x58] sm:$0xff]  ;;  %v26_v9 = vld [vmem:[%s1661_s1 + $0x50] sm:$0xff]  ;;  %933 = vmatprep.mubr.msk.f32.mxu0 %vm1146_vm0, %v1145_v32  ;;  %968 = vmatprep.mubr.msk.f32.mxu1 %vm1146_vm0, %v1145_v32 }
   0x3   :  { %v44_v7 = vmul.f32 %v28_v5, %v28_v5  ;;  %v43_v10 = vmul.f32 %v27_v8, %v27_v8  ;;  %v42_v11 = vmul.f32 %v26_v9, %v26_v9  ;;  %v25_v12 = vld [vmem:[%s1661_s1 + $0x48] sm:$0xff]  ;;  %v24_v13 = vld [vmem:[%s1661_s1 + $0x40] sm:$0xff]  ;;  %v23_v16 = vld [vmem:[%s1661_s1 + $0x38] sm:$0xff] }
   0x4   :  { %78 = vadd.xlane.f32.xlu0 %v47_v3  ;;  %74 = vadd.xlane.f32.xlu1 %v45_v4  ;;  %v41_v14 = vmul.f32 %v25_v12, %v25_v12  ;;  %v40_v15 = vmul.f32 %v24_v13, %v24_v13  ;;  %v22_v17 = vld [vmem:[%s1661_s1 + $0x30] sm:$0xff]  ;;  %v39_v18 = vmul.f32 %v23_v16, %v23_v16  ;;  %v21_v20 = vld [vmem:[%s1661_s1 + $0x28] sm:$0xff]  ;;  %v20_v21 = vld [vmem:[%s1661_s1 + $0x20] sm:$0xff] }
   0x5   :  { %v38_v19 = vmul.f32 %v22_v17, %v22_v17  ;;  %v37_v22 = vmul.f32 %v21_v20, %v21_v20  ;;  %v36_v23 = vmul.f32 %v20_v21, %v20_v21  ;;  %v19_v24 = vld [vmem:[%s1661_s1 + $0x18] sm:$0xff]  ;;  %v18_v25 = vld [vmem:[%s1661_s1 + $0x10] sm:$0xff]  ;;  %v17_v28 = vld [vmem:[%s1661_s1 + $0x8] sm:$0xff] }
   0x6   :  { %v35_v26 = vmul.f32 %v19_v24, %v19_v24  ;;  %v34_v27 = vmul.f32 %v18_v25, %v18_v25  ;;  %v16_v29 = vld [vmem:[%s1661_s1] sm:$0xff]  ;;  %v33_v30 = vmul.f32 %v17_v28, %v17_v28 }
   0x7   :  { %v32_v31 = vmul.f32 %v16_v29, %v16_v29 }
   0x8   :  { %76 = vadd.xlane.f32.xlu0 %v46_v6  ;;  %72 = vadd.xlane.f32.xlu1 %v44_v7  ;;  %v1266_v7 = vld [vmem:[%s1663_s2] ss:$0 sm:$0xff] }
   0xc   :  { %70 = vadd.xlane.f32.xlu0 %v43_v10  ;;  %68 = vadd.xlane.f32.xlu1 %v42_v11 }
  0x10   :  { %66 = vadd.xlane.f32.xlu0 %v41_v14  ;;  %64 = vadd.xlane.f32.xlu1 %v40_v15 }
  0x14   :  { %62 = vadd.xlane.f32.xlu0 %v39_v18  ;;  %60 = vadd.xlane.f32.xlu1 %v38_v19  ;;  %v1286_v19 = vand.u32 4294901760, %v1266_v7 }
  0x18   :  { %58 = vadd.xlane.f32.xlu0 %v37_v22  ;;  %56 = vadd.xlane.f32.xlu1 %v36_v23 }
  0x1c   :  { %54 = vadd.xlane.f32.xlu0 %v35_v26  ;;  %52 = vadd.xlane.f32.xlu1 %v34_v27 }
  0x20   :  { %50 = vadd.xlane.f32.xlu0 %v33_v30  ;;  %48 = vadd.xlane.f32.xlu1 %v32_v31 }
  0x8d   :  { %v79_v34 = vpop.xlane.xlu0 %78  ;;  %v75_v35 = vpop.xlane.xlu1 %74 }
  0x8e   :  { %v112_v36 = vadd.f32 %v1224_v33, %v79_v34  ;;  %v110_v37 = vadd.f32 %v1224_v33, %v75_v35  ;;  %v96_v50 = vmul.f32 %v1224_v33, %v79_v34  ;;  %v94_v52 = vmul.f32 %v1224_v33, %v75_v35 }
  0x90   :  { %1113 = vrcp.f32 %v112_v36 }
  0x91   :  { %1115 = vrcp.f32 %v110_v37  ;;  %v77_v38 = vpop.xlane.xlu0 %76  ;;  %v73_v39 = vpop.xlane.xlu1 %72 }
  0x92   :  { %v111_v40 = vadd.f32 %v1224_v33, %v77_v38  ;;  %v109_v41 = vadd.f32 %v1224_v33, %v73_v39  ;;  %v95_v61 = vmul.f32 %v1224_v33, %v77_v38  ;;  %v93_v0 = vmul.f32 %v1224_v33, %v73_v39 }
  0x94   :  { %1117 = vrcp.f32 %v111_v40 }
  0x95   :  { %1119 = vrcp.f32 %v109_v41  ;;  %v71_v42 = vpop.xlane.xlu0 %70  ;;  %v69_v43 = vpop.xlane.xlu1 %68 }
  0x96   :  { %v108_v44 = vadd.f32 %v1224_v33, %v71_v42  ;;  %v107_v45 = vadd.f32 %v1224_v33, %v69_v43  ;;  %v92_v12 = vmul.f32 %v1224_v33, %v71_v42  ;;  %v91_v16 = vmul.f32 %v1224_v33, %v69_v43 }
  0x98   :  { %1121 = vrcp.f32 %v108_v44 }
  0x99   :  { %1123 = vrcp.f32 %v107_v45  ;;  %v67_v46 = vpop.xlane.xlu0 %66  ;;  %v1232_v47 = vpop.xlane.xlu1 %64 }
  0x9a   :  { %v106_v48 = vadd.f32 %v1224_v33, %v67_v46  ;;  %v105_v49 = vadd.f32 %v1224_v33, %v1232_v47  ;;  %v90_v23 = vmul.f32 %v1224_v33, %v67_v46  ;;  %v89_v36 = vmul.f32 %v1224_v33, %v1232_v47 }
  0x9c   :  { %1125 = vrcp.f32 %v106_v48 }
  0x9d   :  { %v1114_v51 = vpop.eup %1113  ;;  %1127 = vrcp.f32 %v105_v49  ;;  %v1239_v53 = vpop.xlane.xlu0 %62 }
  0x9e   :  { %v1241_v54 = vpop.xlane.xlu1 %60  ;;  %v1116_v55 = vpop.eup %1115  ;;  %v144_v56 = vmul.f32 %v1114_v51, %v96_v50  ;;  %v104_v57 = vadd.f32 %v1224_v33, %v1239_v53  ;;  %v88_v43 = vmul.f32 %v1224_v33, %v1239_v53 }
  0x9f   :  { %v140_v58 = vmul.f32 %v1116_v55, %v94_v52  ;;  %v103_v59 = vadd.f32 %v1224_v33, %v1241_v54  ;;  %v87_v55 = vmul.f32 %v1224_v33, %v1241_v54 }
  0xa0   :  { %v1247_v60 = vand.u32 4294901760, %v144_v56  ;;  %1129 = vrcp.f32 %v104_v57 }
  0xa1   :  { %v1118_v62 = vpop.eup %1117  ;;  %v1250_v63 = vand.u32 4294901760, %v140_v58  ;;  %1131 = vrcp.f32 %v103_v59  ;;  %v1253_v1 = vpop.xlane.xlu0 %58 }
  0xa2   :  { %v1255_v2 = vpop.xlane.xlu1 %56  ;;  %v1120_v3 = vpop.eup %1119  ;;  %v1258_v4 = vsub.f32 %v144_v56, %v1247_v60  ;;  %v142_v5 = vmul.f32 %v1118_v62, %v95_v61  ;;  %v102_v6 = vadd.f32 %v1224_v33, %v1253_v1  ;;  %902 = vmatpush3.msra.mxu0 %v1247_v60 }
  0xa3   :  { %v1269_v8 = vsub.f32 %v140_v58, %v1250_v63  ;;  %v138_v9 = vmul.f32 %v1120_v3, %v93_v0  ;;  %v101_v10 = vadd.f32 %v1224_v33, %v1255_v2  ;;  %903 = vmatprep.subr.mxu0 %v1145_v32  ;;  %v86_v3 = vmul.f32 %v1224_v33, %v1253_v1 }
  0xa4   :  { %v1274_v11 = vand.u32 4294901760, %v142_v5  ;;  %1133 = vrcp.f32 %v102_v6  ;;  %v246_v13 = vand.u32 4294901760, %v1258_v4 }
  0xa5   :  { %v1122_v14 = vpop.eup %1121  ;;  %v1278_v15 = vand.u32 4294901760, %v138_v9  ;;  %1135 = vrcp.f32 %v101_v10  ;;  %v1281_v17 = vpop.xlane.xlu0 %54  ;;  %v260_v28 = vand.u32 4294901760, %v1269_v8 }
  0xa6   :  { %v1283_v18 = vpop.xlane.xlu1 %52  ;;  %v1124_v20 = vpop.eup %1123  ;;  %v1289_v21 = vsub.f32 %v142_v5, %v1274_v11  ;;  %v136_v22 = vmul.f32 %v1122_v14, %v92_v12  ;;  %v100_v24 = vadd.f32 %v1224_v33, %v1281_v17  ;;  %904 = vmatpush3.msra.mxu0 %v1274_v11  ;;  %v247_v30 = vsub.f32 %v1258_v4, %v246_v13 }
  0xa7   :  { %v1296_v25 = vsub.f32 %v138_v9, %v1278_v15  ;;  %v134_v26 = vmul.f32 %v1124_v20, %v91_v16  ;;  %v99_v27 = vadd.f32 %v1224_v33, %v1283_v18  ;;  %905 = vmatprep.subr.mxu0 %v1145_v32  ;;  %v261_v48 = vsub.f32 %v1269_v8, %v260_v28 }
  0xa8   :  { %v1302_v29 = vand.u32 4294901760, %v136_v22  ;;  %1137 = vrcp.f32 %v100_v24  ;;  %906 = vmatpush3.msra.mxu0 %v1250_v63  ;;  %v253_v31 = vand.u32 4294901760, %v1289_v21  ;;  %v248_v50 = vand.u32 4294901760, %v247_v30 }
  0xa9   :  { %v1126_v34 = vpop.eup %1125  ;;  %v1309_v35 = vand.u32 4294901760, %v134_v26  ;;  %1139 = vrcp.f32 %v99_v27  ;;  %v1313_v37 = vpop.xlane.xlu0 %50  ;;  %907 = vmatprep.subr.mxu0 %v1145_v32  ;;  %v267_v39 = vand.u32 4294901760, %v1296_v25  ;;  %v262_v9 = vand.u32 4294901760, %v261_v48 }
  0xaa   :  { %v1315_v38 = vpop.xlane.xlu1 %48  ;;  %v1128_v40 = vpop.eup %1127  ;;  %v1320_v41 = vsub.f32 %v136_v22, %v1302_v29  ;;  %v132_v42 = vmul.f32 %v1126_v34, %v90_v23  ;;  %v98_v44 = vadd.f32 %v1224_v33, %v1313_v37  ;;  %908 = vmatpush3.msra.mxu0 %v1278_v15  ;;  %v254_v51 = vsub.f32 %v1289_v21, %v253_v31 }
  0xab   :  { %v1328_v45 = vsub.f32 %v134_v26, %v1309_v35  ;;  %v130_v46 = vmul.f32 %v1128_v40, %v89_v36  ;;  %v97_v47 = vadd.f32 %v1224_v33, %v1315_v38  ;;  %909 = vmatprep.subr.mxu0 %v1145_v32  ;;  %v268_v56 = vsub.f32 %v1296_v25, %v267_v39 }
  0xac   :  { %v1336_v49 = vand.u32 4294901760, %v132_v42  ;;  %1141 = vrcp.f32 %v98_v44  ;;  %910 = vmatpush3.msra.mxu0 %v1302_v29  ;;  %937 = vmatpush3.msra.mxu1 %v248_v50  ;;  %v255_v61 = vand.u32 4294901760, %v254_v51  ;;  %v274_v62 = vand.u32 4294901760, %v1320_v41 }
  0xad   :  { %v1130_v52 = vpop.eup %1129  ;;  %v1342_v53 = vand.u32 4294901760, %v130_v46  ;;  %1143 = vrcp.f32 %v97_v47  ;;  %911 = vmatprep.subr.mxu0 %v1145_v32  ;;  %938 = vmatprep.subr.mxu1 %v1145_v32  ;;  %v281_v5 = vand.u32 4294901760, %v1328_v45  ;;  %v85_v16 = vmul.f32 %v1224_v33, %v1255_v2 }
  0xae   :  { %v1132_v57 = vpop.eup %1131  ;;  %v1351_v58 = vsub.f32 %v132_v42, %v1336_v49  ;;  %v128_v59 = vmul.f32 %v1130_v52, %v88_v43  ;;  %912 = vmatpush3.msra.mxu0 %v1309_v35  ;;  %939 = vmatpush3.msra.mxu1 %v255_v61  ;;  %v275_v10 = vsub.f32 %v1320_v41, %v274_v62  ;;  %v269_v27 = vand.u32 4294901760, %v268_v56 }
  0xaf   :  { %v1356_v54 = vsub.f32 %v130_v46, %v1342_v53  ;;  %v126_v0 = vmul.f32 %v1132_v57, %v87_v55  ;;  %913 = vmatprep.subr.mxu0 %v1145_v32  ;;  %940 = vmatprep.subr.mxu1 %v1145_v32  ;;  %v1379_v22 = vsub.f32 %v1266_v7, %v1286_v19 }
  0xb0   :  { %v1363_v6 = vand.u32 4294901760, %v128_v59  ;;  %914 = vmatpush3.msra.mxu0 %v1336_v49  ;;  %v288_v12 = vand.u32 4294901760, %v1351_v58  ;;  %941 = vmatpush3.msra.mxu1 %v262_v9  ;;  %v282_v2 = vsub.f32 %v1328_v45, %v281_v5  ;;  %v84_v7 = vmul.f32 %v1224_v33, %v1281_v17 }
  0xb1   :  { %v1134_v14 = vpop.eup %1133  ;;  %v1370_v1 = vand.u32 4294901760, %v126_v0  ;;  %915 = vmatprep.subr.mxu0 %v1145_v32  ;;  %v295_v20 = vand.u32 4294901760, %v1356_v54  ;;  %942 = vmatprep.subr.mxu1 %v1145_v32  ;;  %v276_v40 = vand.u32 4294901760, %v275_v10  ;;  %v83_v17 = vmul.f32 %v1224_v33, %v1283_v18 }
  0xb2   :  { %v1136_v23 = vpop.eup %1135  ;;  %v1382_v24 = vsub.f32 %v128_v59, %v1363_v6  ;;  %v124_v26 = vmul.f32 %v1134_v14, %v86_v3  ;;  %916 = vmatpush3.msra.mxu0 %v1342_v53  ;;  %943 = vmatpush3.msra.mxu1 %v269_v27  ;;  %v289_v42 = vsub.f32 %v1351_v58, %v288_v12  ;;  %v283_v52 = vand.u32 4294901760, %v282_v2 }
  0xb3   :  { %v1389_v30 = vsub.f32 %v126_v0, %v1370_v1  ;;  %v122_v34 = vmul.f32 %v1136_v23, %v85_v16  ;;  %917 = vmatprep.subr.mxu0 %v1145_v32  ;;  %944 = vmatprep.subr.mxu1 %v1145_v32  ;;  %v296_v47 = vsub.f32 %v1356_v54, %v295_v20  ;;  %v235_v59 = vand.u32 4294901760, %v1379_v22 }
  0xb4   :  { %v1395_v36 = vand.u32 4294901760, %v124_v26  ;;  %918 = vmatpush3.msra.mxu0 %v1363_v6  ;;  %v302_v43 = vand.u32 4294901760, %v1382_v24  ;;  %945 = vmatpush3.msra.mxu1 %v276_v40  ;;  %v82_v57 = vmul.f32 %v1224_v33, %v1313_v37  ;;  %v290_v0 = vand.u32 4294901760, %v289_v42 }
  0xb5   :  { %v1138_v44 = vpop.eup %1137  ;;  %v1402_v46 = vand.u32 4294901760, %v122_v34  ;;  %919 = vmatprep.subr.mxu0 %v1145_v32  ;;  %v309_v55 = vand.u32 4294901760, %v1389_v30  ;;  %946 = vmatprep.subr.mxu1 %v1145_v32  ;;  %v81_v14 = vmul.f32 %v1224_v33, %v1315_v38  ;;  %v297_v16 = vand.u32 4294901760, %v296_v47 }
  0xb6   :  { %v1140_v48 = vpop.eup %1139  ;;  %v1412_v50 = vsub.f32 %v124_v26, %v1395_v36  ;;  %v120_v51 = vmul.f32 %v1138_v44, %v84_v7  ;;  %920 = vmatpush3.msra.mxu0 %v1370_v1  ;;  %947 = vmatpush3.msra.mxu1 %v283_v52  ;;  %v303_v3 = vsub.f32 %v1382_v24, %v302_v43 }
  0xb7   :  { %v1417_v18 = vsub.f32 %v122_v34, %v1402_v46  ;;  %v118_v56 = vmul.f32 %v1140_v48, %v83_v17  ;;  %921 = vmatprep.subr.mxu0 %v1145_v32  ;;  %948 = vmatprep.subr.mxu1 %v1145_v32  ;;  %v310_v2 = vsub.f32 %v1389_v30, %v309_v55 }
  0xb8   :  { %v1424_v61 = vand.u32 4294901760, %v120_v51  ;;  %922 = vmatpush3.msra.mxu0 %v1395_v36  ;;  %v316_v9 = vand.u32 4294901760, %v1412_v50  ;;  %949 = vmatpush3.msra.mxu1 %v290_v0  ;;  %v236_v7 = vsub.f32 %v1379_v22, %v235_v59  ;;  %v304_v42 = vand.u32 4294901760, %v303_v3 }
  0xb9   :  { %v1142_v10 = vpop.eup %1141  ;;  %v1431_v37 = vand.u32 4294901760, %v118_v56  ;;  %923 = vmatprep.subr.mxu0 %v1145_v32  ;;  %v323_v34 = vand.u32 4294901760, %v1417_v18  ;;  %950 = vmatprep.subr.mxu1 %v1145_v32 }
  0xba   :  { %v1144_v23 = vpop.eup %1143  ;;  %v1438_v26 = vsub.f32 %v120_v51, %v1424_v61  ;;  %v116_v27 = vmul.f32 %v1142_v10, %v82_v57  ;;  %924 = vmatpush3.msra.mxu0 %v1402_v46  ;;  %951 = vmatpush3.msra.mxu1 %v297_v16  ;;  %v317_v44 = vsub.f32 %v1412_v50, %v316_v9  ;;  %v311_v51 = vand.u32 4294901760, %v310_v2 }
  0xbb   :  { %v1446_v33 = vsub.f32 %v118_v56, %v1431_v37  ;;  %v114_v38 = vmul.f32 %v1144_v23, %v81_v14  ;;  %925 = vmatprep.subr.mxu0 %v1145_v32  ;;  %952 = vmatprep.subr.mxu1 %v1145_v32  ;;  %v324_v52 = vsub.f32 %v1417_v18, %v323_v34  ;;  %v237_v3 = vand.u32 4294901760, %v236_v7 }
  0xbc   :  { %v1453_v40 = vand.u32 4294901760, %v116_v27  ;;  %926 = vmatpush3.msra.mxu0 %v1424_v61  ;;  %v330_v17 = vand.u32 4294901760, %v1438_v26  ;;  %953 = vmatpush3.msra.mxu1 %v304_v42  ;;  %v318_v0 = vand.u32 4294901760, %v317_v44 }
  0xbd   :  { %v1460_v47 = vand.u32 4294901760, %v114_v38  ;;  %927 = vmatprep.subr.mxu0 %v1145_v32  ;;  %v337_v56 = vand.u32 4294901760, %v1446_v33  ;;  %954 = vmatprep.subr.mxu1 %v1145_v32  ;;  %v325_v16 = vand.u32 4294901760, %v324_v52 }
  0xbe   :  { %v1465_v48 = vsub.f32 %v116_v27, %v1453_v40  ;;  %928 = vmatpush3.msra.mxu0 %v1431_v37  ;;  %955 = vmatpush3.msra.mxu1 %v311_v51  ;;  %v331_v10 = vsub.f32 %v1438_v26, %v330_v17 }
  0xbf   :  { %v1473_v57 = vsub.f32 %v114_v38, %v1460_v47  ;;  %929 = vmatprep.subr.mxu0 %v1145_v32  ;;  %956 = vmatprep.subr.mxu1 %v1145_v32  ;;  %v338_v23 = vsub.f32 %v1446_v33, %v337_v56 }
  0xc0   :  { %930 = vmatpush3.msra.mxu0 %v1453_v40  ;;  %v344_v14 = vand.u32 4294901760, %v1465_v48  ;;  %957 = vmatpush3.msra.mxu1 %v318_v0  ;;  %v332_v2 = vand.u32 4294901760, %v331_v10 }
  0xc1   :  { %931 = vmatprep.subr.mxu0 %v1145_v32  ;;  %v351_v27 = vand.u32 4294901760, %v1473_v57  ;;  %958 = vmatprep.subr.mxu1 %v1145_v32  ;;  %v339_v7 = vand.u32 4294901760, %v338_v23 }
  0xc2   :  { %932 = vmatpush3.msra.mxu0 %v1460_v47  ;;  %959 = vmatpush3.msra.mxu1 %v325_v16  ;;  %v345_v38 = vsub.f32 %v1465_v48, %v344_v14 }
  0xc3   :  { %971 = vmatprep.subr.mxu0 %v1145_v32  ;;  %934 = vmatmul.mubr.f32.vlgmr.msra.gmra.mxu0 %v237_v3  ;;  %v352_v42 = vsub.f32 %v1473_v57, %v351_v27 }
  0xc4   :  { %960 = vmatprep.subr.mxu1 %v1145_v32  ;;  %972 = vmatpush3.msra.mxu0 %v1258_v4  ;;  %v346_v44 = vand.u32 4294901760, %v345_v38 }
  0xc5   :  { %961 = vmatpush3.msra.mxu1 %v332_v2  ;;  %973 = vmatprep.subr.mxu0 %v1145_v32  ;;  %v353_v51 = vand.u32 4294901760, %v352_v42 }
  0xc6   :  { %962 = vmatprep.subr.mxu1 %v1145_v32  ;;  %974 = vmatpush3.msra.mxu0 %v1289_v21 }
  0xc7   :  { %963 = vmatpush3.msra.mxu1 %v339_v7  ;;  %975 = vmatprep.subr.mxu0 %v1145_v32 }
  0xc8   :  { %964 = vmatprep.subr.mxu1 %v1145_v32  ;;  %976 = vmatpush3.msra.mxu0 %v1269_v8 }
  0xc9   :  { %965 = vmatpush3.msra.mxu1 %v346_v44  ;;  %977 = vmatprep.subr.mxu0 %v1145_v32 }
  0xca   :  { %966 = vmatprep.subr.mxu1 %v1145_v32  ;;  %978 = vmatpush3.msra.mxu0 %v1296_v25 }
  0xcb   :  { %967 = vmatpush3.msra.mxu1 %v353_v51  ;;  %979 = vmatprep.subr.mxu0 %v1145_v32 }
  0xcc   :  { %969 = vmatmul.mubr.f32.vlgmr.msra.gmra.mxu1 %v1286_v19  ;;  %1006 = vmatprep.subr.mxu1 %v1145_v32 }
  0xcd   :  { %980 = vmatpush3.msra.mxu0 %v1320_v41  ;;  %1007 = vmatpush3.msra.mxu1 %v1247_v60 }
  0xce   :  { %981 = vmatprep.subr.mxu0 %v1145_v32  ;;  %1008 = vmatprep.subr.mxu1 %v1145_v32 }
  0xcf   :  { %982 = vmatpush3.msra.mxu0 %v1328_v45  ;;  %1009 = vmatpush3.msra.mxu1 %v1274_v11 }
  0xd0   :  { %983 = vmatprep.subr.mxu0 %v1145_v32  ;;  %1010 = vmatprep.subr.mxu1 %v1145_v32 }
  0xd1   :  { %984 = vmatpush3.msra.mxu0 %v1351_v58  ;;  %1011 = vmatpush3.msra.mxu1 %v1250_v63 }
  0xd2   :  { %985 = vmatprep.subr.mxu0 %v1145_v32  ;;  %1012 = vmatprep.subr.mxu1 %v1145_v32 }
  0xd3   :  { %986 = vmatpush3.msra.mxu0 %v1356_v54  ;;  %1013 = vmatpush3.msra.mxu1 %v1278_v15 }
  0xd4   :  { %987 = vmatprep.subr.mxu0 %v1145_v32  ;;  %1014 = vmatprep.subr.mxu1 %v1145_v32 }
  0xd5   :  { %988 = vmatpush3.msra.mxu0 %v1382_v24  ;;  %1015 = vmatpush3.msra.mxu1 %v1302_v29 }
  0xd6   :  { %989 = vmatprep.subr.mxu0 %v1145_v32  ;;  %1016 = vmatprep.subr.mxu1 %v1145_v32 }
  0xd7   :  { %990 = vmatpush3.msra.mxu0 %v1389_v30  ;;  %1017 = vmatpush3.msra.mxu1 %v1309_v35 }
  0xd8   :  { %991 = vmatprep.subr.mxu0 %v1145_v32  ;;  %1018 = vmatprep.subr.mxu1 %v1145_v32 }
  0xd9   :  { %992 = vmatpush3.msra.mxu0 %v1412_v50  ;;  %1019 = vmatpush3.msra.mxu1 %v1336_v49 }
  0xda   :  { %993 = vmatprep.subr.mxu0 %v1145_v32  ;;  %1020 = vmatprep.subr.mxu1 %v1145_v32 }
  0xdb   :  { %994 = vmatpush3.msra.mxu0 %v1417_v18  ;;  %1021 = vmatpush3.msra.mxu1 %v1342_v53 }
  0xdc   :  { %995 = vmatprep.subr.mxu0 %v1145_v32  ;;  %1022 = vmatprep.subr.mxu1 %v1145_v32 }
  0xdd   :  { %996 = vmatpush3.msra.mxu0 %v1438_v26  ;;  %1023 = vmatpush3.msra.mxu1 %v1363_v6 }
  0xde   :  { %997 = vmatprep.subr.mxu0 %v1145_v32  ;;  %1024 = vmatprep.subr.mxu1 %v1145_v32 }
  0xdf   :  { %998 = vmatpush3.msra.mxu0 %v1446_v33  ;;  %1025 = vmatpush3.msra.mxu1 %v1370_v1 }
  0xe0   :  { %999 = vmatprep.subr.mxu0 %v1145_v32  ;;  %1026 = vmatprep.subr.mxu1 %v1145_v32 }
  0xe1   :  { %1000 = vmatpush3.msra.mxu0 %v1465_v48  ;;  %1027 = vmatpush3.msra.mxu1 %v1395_v36 }
  0xe2   :  { %1001 = vmatprep.subr.mxu0 %v1145_v32  ;;  %1028 = vmatprep.subr.mxu1 %v1145_v32 }
  0xe3   :  { %1002 = vmatpush3.msra.mxu0 %v1473_v57  ;;  %1003 = vmatprep.mubr.msk.f32.mxu0 %vm1146_vm0, %v1145_v32 }
  0xe4   :  { %1029 = vmatpush3.msra.mxu1 %v1402_v46  ;;  %1004 = vmatmul.mubr.f32.vlgmr.msra.gmra.mxu0 %v1379_v22 }
  0xe5   :  { %1030 = vmatprep.subr.mxu1 %v1145_v32  ;;  %1041 = vmatprep.subr.mxu0 %v1145_v32 }
  0xe6   :  { %1031 = vmatpush3.msra.mxu1 %v1424_v61  ;;  %1042 = vmatpush3.msra.mxu0 %v246_v13 }
  0xe7   :  { %1032 = vmatprep.subr.mxu1 %v1145_v32  ;;  %1043 = vmatprep.subr.mxu0 %v1145_v32 }
  0xe8   :  { %1033 = vmatpush3.msra.mxu1 %v1431_v37  ;;  %1044 = vmatpush3.msra.mxu0 %v253_v31 }
  0xe9   :  { %1034 = vmatprep.subr.mxu1 %v1145_v32  ;;  %1045 = vmatprep.subr.mxu0 %v1145_v32 }
  0xea   :  { %1035 = vmatpush3.msra.mxu1 %v1453_v40  ;;  %1046 = vmatpush3.msra.mxu0 %v260_v28 }
  0xeb   :  { %1036 = vmatprep.subr.mxu1 %v1145_v32  ;;  %1047 = vmatprep.subr.mxu0 %v1145_v32 }
  0xec   :  { %1037 = vmatpush3.msra.mxu1 %v1460_v47  ;;  %1038 = vmatprep.mubr.msk.f32.mxu1 %vm1146_vm0, %v1145_v32 }
  0xed   :  { %1048 = vmatpush3.msra.mxu0 %v267_v39  ;;  %1039 = vmatmul.mubr.f32.vlgmr.msra.gmra.mxu1 %v235_v59 }
  0xee   :  { %1049 = vmatprep.subr.mxu0 %v1145_v32  ;;  %1076 = vmatprep.subr.mxu1 %v1145_v32 }
  0xef   :  { %1050 = vmatpush3.msra.mxu0 %v274_v62  ;;  %1077 = vmatpush3.msra.mxu1 %v1247_v60 }
  0xf0   :  { %1051 = vmatprep.subr.mxu0 %v1145_v32  ;;  %1078 = vmatprep.subr.mxu1 %v1145_v32 }
  0xf1   :  { %1052 = vmatpush3.msra.mxu0 %v281_v5  ;;  %1079 = vmatpush3.msra.mxu1 %v1274_v11 }
  0xf2   :  { %1053 = vmatprep.subr.mxu0 %v1145_v32  ;;  %1080 = vmatprep.subr.mxu1 %v1145_v32 }
  0xf3   :  { %1054 = vmatpush3.msra.mxu0 %v288_v12  ;;  %1081 = vmatpush3.msra.mxu1 %v1250_v63 }
  0xf4   :  { %1055 = vmatprep.subr.mxu0 %v1145_v32  ;;  %1082 = vmatprep.subr.mxu1 %v1145_v32 }
  0xf5   :  { %1056 = vmatpush3.msra.mxu0 %v295_v20  ;;  %1083 = vmatpush3.msra.mxu1 %v1278_v15 }
  0xf6   :  { %1057 = vmatprep.subr.mxu0 %v1145_v32  ;;  %1084 = vmatprep.subr.mxu1 %v1145_v32 }
  0xf7   :  { %1058 = vmatpush3.msra.mxu0 %v302_v43  ;;  %1085 = vmatpush3.msra.mxu1 %v1302_v29 }
  0xf8   :  { %1059 = vmatprep.subr.mxu0 %v1145_v32  ;;  %1086 = vmatprep.subr.mxu1 %v1145_v32 }
  0xf9   :  { %1060 = vmatpush3.msra.mxu0 %v309_v55  ;;  %1087 = vmatpush3.msra.mxu1 %v1309_v35 }
  0xfa   :  { %1061 = vmatprep.subr.mxu0 %v1145_v32  ;;  %1088 = vmatprep.subr.mxu1 %v1145_v32 }
  0xfb   :  { %1062 = vmatpush3.msra.mxu0 %v316_v9  ;;  %1089 = vmatpush3.msra.mxu1 %v1336_v49 }
  0xfc   :  { %1063 = vmatprep.subr.mxu0 %v1145_v32  ;;  %1090 = vmatprep.subr.mxu1 %v1145_v32 }
  0xfd   :  { %1064 = vmatpush3.msra.mxu0 %v323_v34  ;;  %1091 = vmatpush3.msra.mxu1 %v1342_v53 }
  0xfe   :  { %1065 = vmatprep.subr.mxu0 %v1145_v32  ;;  %1092 = vmatprep.subr.mxu1 %v1145_v32 }
  0xff   :  { %1066 = vmatpush3.msra.mxu0 %v330_v17  ;;  %1093 = vmatpush3.msra.mxu1 %v1363_v6 }
 0x100   :  { %1067 = vmatprep.subr.mxu0 %v1145_v32  ;;  %1094 = vmatprep.subr.mxu1 %v1145_v32 }
 0x101   :  { %1068 = vmatpush3.msra.mxu0 %v337_v56  ;;  %1095 = vmatpush3.msra.mxu1 %v1370_v1 }
 0x102   :  { %1069 = vmatprep.subr.mxu0 %v1145_v32  ;;  %1096 = vmatprep.subr.mxu1 %v1145_v32 }
 0x103   :  { %1070 = vmatpush3.msra.mxu0 %v344_v14  ;;  %1097 = vmatpush3.msra.mxu1 %v1395_v36 }
 0x104   :  { %1071 = vmatprep.subr.mxu0 %v1145_v32  ;;  %1098 = vmatprep.subr.mxu1 %v1145_v32 }
 0x105   :  { %1072 = vmatpush3.msra.mxu0 %v351_v27  ;;  %1073 = vmatprep.mubr.msk.f32.mxu0 %vm1146_vm0, %v1145_v32 }
 0x106   :  { %1099 = vmatpush3.msra.mxu1 %v1402_v46  ;;  %1074 = vmatmul.mubr.f32.vlgmr.msra.gmra.mxu0 %v1286_v19 }
 0x107   :  { %1100 = vmatprep.subr.mxu1 %v1145_v32  ;;  %1108 = vmatprep.mubr.msk.f32.mxu1 %vm1146_vm0, %v1145_v32 }
 0x108   :  { %1101 = vmatpush3.msra.mxu1 %v1424_v61 }
 0x109   :  { %1102 = vmatprep.subr.mxu1 %v1145_v32 }
 0x10a   :  { %1103 = vmatpush3.msra.mxu1 %v1431_v37 }
 0x10b   :  { %1104 = vmatprep.subr.mxu1 %v1145_v32 }
 0x10c   :  { %1105 = vmatpush3.msra.mxu1 %v1453_v40 }
 0x10d   :  { %1106 = vmatprep.subr.mxu1 %v1145_v32 }
 0x10e   :  { %1107 = vmatpush3.msra.mxu1 %v1460_v47 }
 0x10f   :  { %1109 = vmatmul.mubr.f32.vlgmr.msra.gmra.mxu1 %v1286_v19 }
 0x183   :  { %v239_v60 = vpop.f32.mrf.mxu0 }
 0x185   :  { %v935_v63 = vpop.f32.mrf.mxu0 }
 0x18c   :  { %v390_v4 = vpop.f32.mrf.mxu1 }
 0x18d   :  { %v391_v28 = vadd.f32 %v390_v4, %v239_v60 }
 0x18e   :  { %v970_v8 = vpop.f32.mrf.mxu1 }
 0x1a4   :  { %v494_v11 = vpop.f32.mrf.mxu0 }
 0x1a5   :  { %v495_v31 = vadd.f32 %v494_v11, %v391_v28 }
 0x1a6   :  { %v1005_v13 = vpop.f32.mrf.mxu0 }
 0x1ad   :  { %v583_v15 = vpop.f32.mrf.mxu1 }
 0x1ae   :  { %v584_v35 = vadd.f32 %v583_v15, %v495_v31 }
 0x1af   :  { %v1040_v21 = vpop.f32.mrf.mxu1 }
 0x1c6   :  { %v702_v25 = vpop.f32.mrf.mxu0 }
 0x1c7   :  { %v703_v39 = vadd.f32 %v702_v25, %v584_v35 }
 0x1c8   :  { %v1075_v29 = vpop.f32.mrf.mxu0 }
 0x1cf   :  { %v789_v41 = vpop.f32.mrf.mxu1 }
 0x1d0   :  { %v790_v32 = vadd.f32 %v789_v41, %v703_v39 }
 0x1d1   :  { %v1110_v45 = vpop.f32.mrf.mxu1 }
 0x1d2   :  { %793 = vst [vmem:[%s1664_s3] sm:$0xff] %v790_v32 }

</bundles_post_ra>
